<compile_context>
chip_gen: v7x
topology: tpu7x:2x2x1
jax: 0.10.0
libtpu: 0.0.40
codegen_flags: <defaults>
</compile_context>

<pallas_src>
import functools
import math

import jax
import jax.numpy as jnp
import numpy as np
from jax.experimental import pallas as pl
from jax.experimental.pallas import tpu as pltpu

_BIG_SQ = 1e30                                   # squared-norm filler for padded columns
_LABEL_SENTINEL = np.iinfo(np.int32).min         # never equal to a real class label


def _triplet_kernel(xq_ref, xk_ref, sqr_ref, sqc_ref, labr_ref, labc_ref,
                    hinge_ref, ap2_acc, an2_acc, *, margin, block_k):
    k = pl.program_id(1)
    nk = pl.num_programs(1)

    @pl.when(k == 0)
    def _():
        ap2_acc[...] = jnp.full_like(ap2_acc, -jnp.inf)
        an2_acc[...] = jnp.full_like(an2_acc, jnp.inf)

    # Gram tile on the MXU (bf16 inputs when enabled by the wrapper; f32 accumulate).
    gram = jax.lax.dot_general(
        xq_ref[...], xk_ref[...], (((1,), (1,)), ((), ())),
        preferred_element_type=jnp.float32)                     # (TQ, TK)

    # Column slices of the VMEM-resident (1, n_pad) vectors (no per-step DMA).
    start = pl.multiple_of(k * block_k, block_k)
    sq_c = sqc_ref[:, pl.ds(start, block_k)]                    # (1, TK) f32
    lab_c = labc_ref[:, pl.ds(start, block_k)]                  # (1, TK) i32

    # Partial squared distance; the row-norm term is added once in the epilogue
    # (constant per row, so it commutes with the max/min selection).
    part = sq_c - 2.0 * gram                                    # (TQ, TK)

    # One same-label mask tile feeds both selects (diagonal counts as positive,
    # exactly like the PyTorch reference).
    mask = labr_ref[...] == lab_c                               # (TQ, TK) bool

    # Pure-VPU elementwise running max/min into lane-dense accumulators; the single
    # cross-lane (XLU) reduce is deferred to the per-row-block epilogue.
    ap2_acc[...] = jnp.maximum(ap2_acc[...], jnp.where(mask, part, -jnp.inf))
    an2_acc[...] = jnp.minimum(an2_acc[...], jnp.where(mask, jnp.inf, part))

    @pl.when(k == nk - 1)
    def _():
        sq_r = sqr_ref[...]                                     # (TQ, 1)
        ap2 = jnp.max(ap2_acc[...], axis=1, keepdims=True) + sq_r
        an2 = jnp.min(an2_acc[...], axis=1, keepdims=True) + sq_r
        # sqrt is monotone -> selecting on dist^2 equals selecting on dist;
        # clamp(min=1e-12).sqrt() from the reference is applied only to the winners.
        dist_ap = jnp.sqrt(jnp.maximum(ap2, 1e-12))
        dist_an = jnp.sqrt(jnp.maximum(an2, 1e-12))
        # MarginRankingLoss(margin)(dist_an, dist_ap, y=1) per row.
        hinge_ref[...] = jnp.maximum(dist_ap - dist_an + margin, 0.0)


def _round_up(a, b):
    return (a + b - 1) // b * b


def triplet_loss(inputs, targets, margin=0.6, *, block_q=256, block_k=256,
                 use_bf16=True):
    """inputs: (n, feat_dim) float; targets: (n, 2) int (class label in column 1)."""
    n, d = inputs.shape
    x = inputs.astype(jnp.float32)
    labels = targets[:, 1].astype(jnp.int32)

    # Cap the tiles for small batches so we don't over-pad; keep 128-multiples.
    bq = min(block_q, _round_up(n, 128))
    bk = min(block_k, _round_up(n, 128))
    n_pad = _round_up(n, math.lcm(bq, bk))
    d_pad = _round_up(d, 128)

    # Zero-pad features (zeros don't change norms / dot products).
    if (n_pad, d_pad) != (n, d):
        x = jnp.pad(x, ((0, n_pad - n), (0, d_pad - d)))

    # bf16 feeds the MXU natively on v5e/v6e/v7x (f32 accumulate). The squared norms are
    # computed from the *same* (possibly rounded) values the Gram uses so the diagonal of
    # dist^2 stays ~0 and the ||a||^2+||b||^2-2ab expansion stays self-consistent.
    x_mm = x.astype(jnp.bfloat16) if use_bf16 else x
    x_sq = x_mm.astype(jnp.float32)
    sq = jnp.sum(x_sq * x_sq, axis=1)                           # (n_pad,) f32

    # Padded entries get a sentinel label / huge norm so they never win a selection.
    if n_pad != n:
        labels = jnp.pad(labels, (0, n_pad - n), constant_values=_LABEL_SENTINEL)
    lab_row = labels[:, None]                                   # (n_pad, 1)
    lab_col = labels[None, :]                                   # (1, n_pad)

    col_valid = jnp.arange(n_pad) < n
    sq_row = sq[:, None]                                        # (n_pad, 1)
    sq_col = jnp.where(col_valid, sq, _BIG_SQ)[None, :]         # (1, n_pad)

    gi, gk = n_pad // bq, n_pad // bk
    kernel = functools.partial(_triplet_kernel, margin=float(margin), block_k=bk)

    itemsize = jnp.dtype(x_mm.dtype).itemsize
    cost = pl.CostEstimate(
        flops=int(2 * n_pad * n_pad * d_pad + 6 * n_pad * n_pad),
        transcendentals=int(2 * n_pad),
        bytes_accessed=int(itemsize * n_pad * d_pad * (gi + 1) + 4 * 4 * n_pad),
    )

    hinges = pl.pallas_call(
        kernel,
        out_shape=jax.ShapeDtypeStruct((n_pad, 1), jnp.float32),
        grid_spec=pltpu.PrefetchScalarGridSpec(
            num_scalar_prefetch=0,
            grid=(gi, gk),
            in_specs=[
                pl.BlockSpec((bq, d_pad), lambda i, k: (i, 0)),   # x row block (resident per i)
                pl.BlockSpec((bk, d_pad), lambda i, k: (k, 0)),   # x col block (streamed)
                pl.BlockSpec((bq, 1), lambda i, k: (i, 0)),       # ||x_row||^2
                pl.BlockSpec((1, n_pad), lambda i, k: (0, 0)),    # ||x_col||^2 (fully resident)
                pl.BlockSpec((bq, 1), lambda i, k: (i, 0)),       # labels (rows)
                pl.BlockSpec((1, n_pad), lambda i, k: (0, 0)),    # labels (cols, fully resident)
            ],
            out_specs=pl.BlockSpec((bq, 1), lambda i, k: (i, 0)),
            scratch_shapes=[
                pltpu.VMEM((bq, bk), jnp.float32),  # running max of (dist^2 - ||x_row||^2), positives
                pltpu.VMEM((bq, bk), jnp.float32),  # running min of (dist^2 - ||x_row||^2), negatives
            ],
        ),
        compiler_params=pltpu.CompilerParams(
            dimension_semantics=("parallel", "arbitrary")),
        cost_estimate=cost,
    )(x_mm, x_mm, sq_row, sq_col, lab_row, lab_col)

    # Mean over the real rows only (tiny reduction; stays in the wrapper so the row grid
    # axis can be "parallel").
    # TODO(synk): rows with no in-batch negative contribute 0 here, whereas PyTorch's
    # masked .min() over an empty selection would raise.
    return jnp.mean(hinges[:n, 0])


def _triplet_loss_ref(inputs, targets, margin=0.6):
    """Pure numpy reference mirroring the PyTorch forward."""
    x = np.asarray(inputs, dtype=np.float64)
    labels = np.asarray(targets)[:, 1]
    n = x.shape[0]
    sq = (x * x).sum(axis=1, keepdims=True)
    dist = sq + sq.T - 2.0 * x @ x.T
    dist = np.sqrt(np.clip(dist, 1e-12, None))
    mask = labels[:, None] == labels[None, :]
    dist_ap = np.array([dist[i][mask[i]].max() for i in range(n)])
    dist_an = np.array([dist[i][~mask[i]].min() for i in range(n)])
    return np.mean(np.maximum(dist_ap - dist_an + margin, 0.0))


if __name__ == "__main__":
    key = jax.random.PRNGKey(0)

    # Small case (matches the module's expected shapes: (n, feat_dim) + (n, 2) targets).
    n, feat_dim = 8, 32
    inputs = jax.random.normal(key, (n, feat_dim), dtype=jnp.float32)
    labels = jnp.array([0, 0, 1, 1, 2, 2, 3, 3], dtype=jnp.int32)
    targets = jnp.stack([jnp.arange(n, dtype=jnp.int32), labels], axis=1)
    ref = _triplet_loss_ref(np.asarray(inputs), np.asarray(targets), margin=0.6)

    loss_bf16 = triplet_loss(inputs, targets, margin=0.6)                  # default bf16 MXU path
    jax.block_until_ready(loss_bf16)
    assert np.allclose(float(loss_bf16), ref, rtol=1e-2, atol=1e-2), (float(loss_bf16), ref)

    loss_f32 = triplet_loss(inputs, targets, margin=0.6, use_bf16=False)   # exact-precision path
    jax.block_until_ready(loss_f32)
    assert np.allclose(float(loss_f32), ref, rtol=1e-4, atol=1e-4), (float(loss_f32), ref)

    # Multi-tile case: exercises the 2x2 grid of 256-tiles, padding, the resident column
    # vectors and the lane-dense running max/min accumulators across column blocks.
    k1, k2 = jax.random.split(jax.random.PRNGKey(0))
    n2, d2 = 300, 96
    x2 = jax.random.normal(k1, (n2, d2), dtype=jnp.float32)
    lab2 = jax.random.randint(k2, (n2,), 0, 7, dtype=jnp.int32)
    tgt2 = jnp.stack([jnp.arange(n2, dtype=jnp.int32), lab2], axis=1)
    ref2 = _triplet_loss_ref(np.asarray(x2), np.asarray(tgt2), margin=0.6)

    loss2_bf16 = triplet_loss(x2, tgt2, margin=0.6)
    jax.block_until_ready(loss2_bf16)
    assert np.allclose(float(loss2_bf16), ref2, rtol=5e-3, atol=5e-3), (float(loss2_bf16), ref2)

    loss2_f32 = triplet_loss(x2, tgt2, margin=0.6, use_bf16=False)
    jax.block_until_ready(loss2_f32)
    assert np.allclose(float(loss2_f32), ref2, rtol=1e-3, atol=1e-3), (float(loss2_f32), ref2)

    print("KERNEL_OK")
</pallas_src>

<mosaic_0001>
module attributes {stable_mosaic.version = 11 : i64} {
  func.func @_triplet_kernel(%arg0: i32, %arg1: i32, %arg2: memref<128x128xbf16, #tpu.memory_space<vmem>>, %arg3: memref<128x128xbf16, #tpu.memory_space<vmem>>, %arg4: memref<128x1xf32, #tpu.memory_space<vmem>>, %arg5: memref<1x128xf32, #tpu.memory_space<vmem>>, %arg6: memref<128x1xi32, #tpu.memory_space<vmem>>, %arg7: memref<1x128xi32, #tpu.memory_space<vmem>>, %arg8: memref<128x1xf32, #tpu.memory_space<vmem>>, %arg9: memref<128x128xf32, #tpu.memory_space<vmem>>, %arg10: memref<128x128xf32, #tpu.memory_space<vmem>>) attributes {dimension_semantics = [#tpu.dimension_semantics<parallel>, #tpu.dimension_semantics<arbitrary>], iteration_bounds = array<i64: 1, 1>, scalar_prefetch = 0 : i64, scratch_operands = 2 : i64, tpu.core_type = #tpu.core_type<tc>, window_params = [{transform_indices = @transform_0, window_bounds = array<i64: 128, 128>}, {transform_indices = @transform_1, window_bounds = array<i64: 128, 128>}, {transform_indices = @transform_2, window_bounds = array<i64: 128, 1>}, {pipeline_mode = #tpu.pipeline_mode<synchronous>, transform_indices = @transform_3, window_bounds = array<i64: 1, 128>}, {transform_indices = @transform_4, window_bounds = array<i64: 128, 1>}, {pipeline_mode = #tpu.pipeline_mode<synchronous>, transform_indices = @transform_5, window_bounds = array<i64: 1, 128>}, {transform_indices = @transform_6, window_bounds = array<i64: 128, 1>}]} {
    %c0_i32 = arith.constant 0 : i32
    %0 = arith.cmpi eq, %arg1, %c0_i32 : i32
    %1 = arith.extui %0 : i1 to i32
    %c0_i32_0 = arith.constant 0 : i32
    %2 = arith.cmpi ne, %1, %c0_i32_0 : i32
    scf.if %2 {
      %cst_21 = arith.constant 0xFF800000 : f32
      %33 = vector.broadcast %cst_21 : f32 to vector<128x128xf32>
      %c0_22 = arith.constant 0 : index
      %c0_23 = arith.constant 0 : index
      %34 = vector.load %arg9[%c0_22, %c0_23] : memref<128x128xf32, #tpu.memory_space<vmem>>, vector<128x128xf32>
      tpu.vector_store %arg9[%c0_22, %c0_23], %33 {strides = array<i32>} : memref<128x128xf32, #tpu.memory_space<vmem>>, vector<128x128xf32>,
      %cst_24 = arith.constant 0x7F800000 : f32
      %35 = vector.broadcast %cst_24 : f32 to vector<128x128xf32>
      %c0_25 = arith.constant 0 : index
      %c0_26 = arith.constant 0 : index
      %36 = vector.load %arg10[%c0_25, %c0_26] : memref<128x128xf32, #tpu.memory_space<vmem>>, vector<128x128xf32>
      tpu.vector_store %arg10[%c0_25, %c0_26], %35 {strides = array<i32>} : memref<128x128xf32, #tpu.memory_space<vmem>>, vector<128x128xf32>,
    } else {
    }
    %c0 = arith.constant 0 : index
    %c0_1 = arith.constant 0 : index
    %3 = vector.load %arg2[%c0, %c0_1] : memref<128x128xbf16, #tpu.memory_space<vmem>>, vector<128x128xbf16>
    %c0_2 = arith.constant 0 : index
    %c0_3 = arith.constant 0 : index
    %4 = vector.load %arg3[%c0_2, %c0_3] : memref<128x128xbf16, #tpu.memory_space<vmem>>, vector<128x128xbf16>
    %cst = arith.constant dense<0.000000e+00> : vector<128x128xf32>
    %5 = tpu.matmul %3, %4, %cst {dimension_numbers = #tpu.dot_dimension_numbers<[1], [1], [0], [0], [0, 0, 1, 0], [], []>} : vector<128x128xbf16>, vector<128x128xbf16>, vector<128x128xf32> -> vector<128x128xf32>
    %c128_i32 = arith.constant 128 : i32
    %6 = arith.muli %arg1, %c128_i32 : i32
    %7 = tpu.assume_multiple %6, 128 : i32
    %c0_4 = arith.constant 0 : index
    %8 = arith.index_cast %7 : i32 to index
    %9 = vector.load %arg5[%c0_4, %8] : memref<1x128xf32, #tpu.memory_space<vmem>>, vector<1x128xf32>
    %c0_5 = arith.constant 0 : index
    %10 = arith.index_cast %7 : i32 to index
    %11 = vector.load %arg7[%c0_5, %10] : memref<1x128xi32, #tpu.memory_space<vmem>>, vector<1x128xi32>
    %cst_6 = arith.constant 2.000000e+00 : f32
    %12 = vector.broadcast %cst_6 : f32 to vector<128x128xf32>
    %13 = arith.mulf %12, %5 : vector<128x128xf32>
    %14 = vector.broadcast %9 : vector<1x128xf32> to vector<128x128xf32>
    %15 = arith.subf %14, %13 : vector<128x128xf32>
    %c0_7 = arith.constant 0 : index
    %c0_8 = arith.constant 0 : index
    %16 = vector.load %arg6[%c0_7, %c0_8] : memref<128x1xi32, #tpu.memory_space<vmem>>, vector<128x1xi32>
    %17 = vector.broadcast %16 : vector<128x1xi32> to vector<128x128xi32>
    %18 = vector.broadcast %11 : vector<1x128xi32> to vector<128x128xi32>
    %19 = arith.cmpi eq, %17, %18 : vector<128x128xi32>
    %c0_9 = arith.constant 0 : index
    %c0_10 = arith.constant 0 : index
    %20 = vector.load %arg9[%c0_9, %c0_10] : memref<128x128xf32, #tpu.memory_space<vmem>>, vector<128x128xf32>
    %cst_11 = arith.constant 0xFF800000 : f32
    %21 = vector.broadcast %cst_11 : f32 to vector<128x128xf32>
    %22 = arith.select %19, %15, %21 : vector<128x128xi1>, vector<128x128xf32>
    %23 = arith.maximumf %20, %22 : vector<128x128xf32>
    %c0_12 = arith.constant 0 : index
    %c0_13 = arith.constant 0 : index
    %24 = vector.load %arg9[%c0_12, %c0_13] : memref<128x128xf32, #tpu.memory_space<vmem>>, vector<128x128xf32>
    tpu.vector_store %arg9[%c0_12, %c0_13], %23 {strides = array<i32>} : memref<128x128xf32, #tpu.memory_space<vmem>>, vector<128x128xf32>,
    %c0_14 = arith.constant 0 : index
    %c0_15 = arith.constant 0 : index
    %25 = vector.load %arg10[%c0_14, %c0_15] : memref<128x128xf32, #tpu.memory_space<vmem>>, vector<128x128xf32>
    %cst_16 = arith.constant 0x7F800000 : f32
    %26 = vector.broadcast %cst_16 : f32 to vector<128x128xf32>
    %27 = arith.select %19, %26, %15 : vector<128x128xi1>, vector<128x128xf32>
    %28 = arith.minimumf %25, %27 : vector<128x128xf32>
    %c0_17 = arith.constant 0 : index
    %c0_18 = arith.constant 0 : index
    %29 = vector.load %arg10[%c0_17, %c0_18] : memref<128x128xf32, #tpu.memory_space<vmem>>, vector<128x128xf32>
    tpu.vector_store %arg10[%c0_17, %c0_18], %28 {strides = array<i32>} : memref<128x128xf32, #tpu.memory_space<vmem>>, vector<128x128xf32>,
    %c0_i32_19 = arith.constant 0 : i32
    %30 = arith.cmpi eq, %arg1, %c0_i32_19 : i32
    %31 = arith.extui %30 : i1 to i32
    %c0_i32_20 = arith.constant 0 : i32
    %32 = arith.cmpi ne, %31, %c0_i32_20 : i32
    scf.if %32 {
      %c0_21 = arith.constant 0 : index
      %c0_22 = arith.constant 0 : index
      %33 = vector.load %arg4[%c0_21, %c0_22] : memref<128x1xf32, #tpu.memory_space<vmem>>, vector<128x1xf32>
      %c0_23 = arith.constant 0 : index
      %c0_24 = arith.constant 0 : index
      %34 = vector.load %arg9[%c0_23, %c0_24] : memref<128x128xf32, #tpu.memory_space<vmem>>, vector<128x128xf32>
      %cst_25 = arith.constant dense<0xFF800000> : vector<128xf32>
      %35 = vector.multi_reduction <maximumf>, %34, %cst_25 [1] : vector<128x128xf32> to vector<128xf32>
      %36 = vector.shape_cast %35 : vector<128xf32> to vector<128x1xf32>
      %37 = arith.addf %36, %33 : vector<128x1xf32>
      %c0_26 = arith.constant 0 : index
      %c0_27 = arith.constant 0 : index
      %38 = vector.load %arg10[%c0_26, %c0_27] : memref<128x128xf32, #tpu.memory_space<vmem>>, vector<128x128xf32>
      %cst_28 = arith.constant dense<0x7F800000> : vector<128xf32>
      %39 = vector.multi_reduction <minimumf>, %38, %cst_28 [1] : vector<128x128xf32> to vector<128xf32>
      %40 = vector.shape_cast %39 : vector<128xf32> to vector<128x1xf32>
      %41 = arith.addf %40, %33 : vector<128x1xf32>
      %cst_29 = arith.constant 9.99999996E-13 : f32
      %42 = vector.broadcast %cst_29 : f32 to vector<128x1xf32>
      %43 = arith.maximumf %37, %42 : vector<128x1xf32>
      %44 = math.sqrt %43 : vector<128x1xf32>
      %cst_30 = arith.constant 9.99999996E-13 : f32
      %45 = vector.broadcast %cst_30 : f32 to vector<128x1xf32>
      %46 = arith.maximumf %41, %45 : vector<128x1xf32>
      %47 = math.sqrt %46 : vector<128x1xf32>
      %48 = arith.subf %44, %47 : vector<128x1xf32>
      %cst_31 = arith.constant 6.000000e-01 : f32
      %49 = vector.broadcast %cst_31 : f32 to vector<128x1xf32>
      %50 = arith.addf %48, %49 : vector<128x1xf32>
      %cst_32 = arith.constant 0.000000e+00 : f32
      %51 = vector.broadcast %cst_32 : f32 to vector<128x1xf32>
      %52 = arith.maximumf %50, %51 : vector<128x1xf32>
      %c0_33 = arith.constant 0 : index
      %c0_34 = arith.constant 0 : index
      %53 = vector.load %arg8[%c0_33, %c0_34] : memref<128x1xf32, #tpu.memory_space<vmem>>, vector<128x1xf32>
      tpu.vector_store %arg8[%c0_33, %c0_34], %52 {strides = array<i32>} : memref<128x1xf32, #tpu.memory_space<vmem>>, vector<128x1xf32>,
    } else {
    }
    return
  }
  func.func @transform_0(%arg0: i32, %arg1: i32) -> (i32, i32) {
    %c0_i32 = arith.constant 0 : i32
    %c0_i32_0 = arith.constant 0 : i32
    return %arg0, %c0_i32 : i32, i32
  }
  func.func @transform_1(%arg0: i32, %arg1: i32) -> (i32, i32) {
    %c0_i32 = arith.constant 0 : i32
    %c0_i32_0 = arith.constant 0 : i32
    return %arg1, %c0_i32 : i32, i32
  }
  func.func @transform_2(%arg0: i32, %arg1: i32) -> (i32, i32) {
    %c0_i32 = arith.constant 0 : i32
    %c0_i32_0 = arith.constant 0 : i32
    return %arg0, %c0_i32 : i32, i32
  }
  func.func @transform_3(%arg0: i32, %arg1: i32) -> (i32, i32) {
    %c0_i32 = arith.constant 0 : i32
    %c0_i32_0 = arith.constant 0 : i32
    %c0_i32_1 = arith.constant 0 : i32
    return %c0_i32, %c0_i32_0 : i32, i32
  }
  func.func @transform_4(%arg0: i32, %arg1: i32) -> (i32, i32) {
    %c0_i32 = arith.constant 0 : i32
    %c0_i32_0 = arith.constant 0 : i32
    return %arg0, %c0_i32 : i32, i32
  }
  func.func @transform_5(%arg0: i32, %arg1: i32) -> (i32, i32) {
    %c0_i32 = arith.constant 0 : i32
    %c0_i32_0 = arith.constant 0 : i32
    %c0_i32_1 = arith.constant 0 : i32
    return %c0_i32, %c0_i32_0 : i32, i32
  }
  func.func @transform_6(%arg0: i32, %arg1: i32) -> (i32, i32) {
    %c0_i32 = arith.constant 0 : i32
    %c0_i32_0 = arith.constant 0 : i32
    return %arg0, %c0_i32 : i32, i32
  }
}

</mosaic_0001>

<bundles_post_ra>
// kernel: tpu_custom_call.1
= control target key start
LH: loop header
LB: loop body
LE: loop exit
PB: predicated region body
PF: predicated region fallthrough
CT: control target
= control target key end

     0   :  { %v1181_v1 = vmov 0   ;;  %s1882_s1 = inlined_call_operand.vmem [shape: bf16[128,128], index: 1, kind: input, shape index: {}]   ;;  %s1883_s0 = inlined_call_operand.vmem [shape: bf16[128,128], index: 0, kind: input, shape index: {}]   ;;  %s1884_s4 = inlined_call_operand.vmem [shape: s32[128,1], index: 4, kind: input, shape index: {}]   ;;  %s1885_s3 = inlined_call_operand.vmem [shape: f32[1,128], index: 3, kind: input, shape index: {}]   ;;  %s1886_s5 = inlined_call_operand.vmem [shape: s32[1,128], index: 5, kind: input, shape index: {}]   ;;  %s1887_s2 = inlined_call_operand.vmem [shape: f32[128,1], index: 2, kind: input, shape index: {}]   ;;  %s1888_s6 = inlined_call_operand.vmem [shape: f32[128,1], index: 6, kind: output, shape index: {}]  }
   0x1   :  { %v1101_v0 = vld [vmem:[%s1882_s1] sm:$0xff]   ;;  %1099 = vset.pattern.permute.xlu0 %v1181_v1  ;;  %1100 = vset.pattern.permute.xlu1 %v1181_v1  ;;  %v1102_v2 = vld [vmem:[%s1882_s1 + $0x8] sm:$0xff]   ;;  %v1103_v3 = vld [vmem:[%s1882_s1 + $0x10] sm:$0xff]  }
   0x2   :  { %1050 = vmatprep.subr.bf16.mxu0 %v1101_v0  ;;  %1082 = vmatprep.subr.bf16.mxu1 %v1101_v0  ;;  %v1109_v4 = vld [vmem:[%s1883_s0] sm:$0xff]   ;;  %v1104_v6 = vld [vmem:[%s1882_s1 + $0x18] sm:$0xff]   ;;  %v332_v8 = vld [vmem:[%s1884_s4 + $0x10] sm:$0xff] }
   0x3   :  { %1051 = vmatpush3.bf16.xpose.msra.mxu0 %v1101_v0  ;;  %1090 = vmatpush3.bf16.xpose.msra.mxu1 %v1101_v0  ;;  %v1110_v5 = vld [vmem:[%s1883_s0 + $0x20] sm:$0xff]   ;;  %v331_v9 = vld [vmem:[%s1884_s4 + $0x8] sm:$0xff]  ;;  %v333_v10 = vld [vmem:[%s1884_s4 + $0x18] sm:$0xff] }
   0x4   :  { %1052 = vmatprep.subr.bf16.mxu0 %v1102_v2  ;;  %1083 = vmatprep.subr.bf16.mxu1 %v1102_v2  ;;  %v330_v7 = vld [vmem:[%s1884_s4] sm:$0xff]  ;;  %v335_v12 = vld [vmem:[%s1884_s4 + $0x28] sm:$0xff]  ;;  %v336_v14 = vld [vmem:[%s1884_s4 + $0x30] sm:$0xff] }
   0x5   :  { %1066 = vmatprep.mubr.bf16.mxu0 %v1109_v4  ;;  %1074 = vmatprep.mubr.bf16.mxu1 %v1110_v5  ;;  %v334_v11 = vld [vmem:[%s1884_s4 + $0x20] sm:$0xff]  ;;  %v337_v15 = vld [vmem:[%s1884_s4 + $0x38] sm:$0xff]  ;;  %v339_v17 = vld [vmem:[%s1884_s4 + $0x48] sm:$0xff] }
   0x6   :  { %347 = vperm.xlu0 %1099, %v330_v7   ;;  %353 = vperm.xlu1 %1100, %v332_v8   ;;  %v1105_v13 = vld [vmem:[%s1882_s1 + $0x20] sm:$0xff]   ;;  %v1106_v18 = vld [vmem:[%s1882_s1 + $0x28] sm:$0xff]   ;;  %v340_v19 = vld [vmem:[%s1884_s4 + $0x50] sm:$0xff] }
   0x7   :  { %v338_v16 = vld [vmem:[%s1884_s4 + $0x40] sm:$0xff]  ;;  %v341_v20 = vld [vmem:[%s1884_s4 + $0x58] sm:$0xff]  ;;  %v343_v22 = vld [vmem:[%s1884_s4 + $0x68] sm:$0xff] }
   0x8   :  { %v342_v21 = vld [vmem:[%s1884_s4 + $0x60] sm:$0xff]  ;;  %v1107_v23 = vld [vmem:[%s1882_s1 + $0x30] sm:$0xff]   ;;  %v345_v25 = vld [vmem:[%s1884_s4 + $0x78] sm:$0xff] }
   0x9   :  { %v344_v24 = vld [vmem:[%s1884_s4 + $0x70] sm:$0xff]  ;;  %v1108_v26 = vld [vmem:[%s1882_s1 + $0x38] sm:$0xff]   ;;  %v1111_v27 = vld [vmem:[%s1883_s0 + $0x8] sm:$0xff]  }
   0xa   :  { %350 = vperm.xlu0 %1099, %v331_v9   ;;  %356 = vperm.xlu1 %1100, %v333_v10   ;;  %v1112_v28 = vld [vmem:[%s1883_s0 + $0x28] sm:$0xff]   ;;  %v1113_v29 = vld [vmem:[%s1883_s0 + $0x10] sm:$0xff]   ;;  %v1115_v31 = vld [vmem:[%s1883_s0 + $0x18] sm:$0xff]  }
   0xb   :  { %1053 = vmatpush3.bf16.xpose.msra.mxu0 %v1102_v2  ;;  %1091 = vmatpush3.bf16.xpose.msra.mxu1 %v1102_v2  ;;  %v1114_v30 = vld [vmem:[%s1883_s0 + $0x30] sm:$0xff]   ;;  %v1116_v32 = vld [vmem:[%s1883_s0 + $0x38] sm:$0xff]   ;;  %v1332_v45 = vld [vmem:[%s1885_s3] ss:$0 sm:$0xff] }
   0xc   :  { %1054 = vmatprep.subr.bf16.mxu0 %v1103_v3  ;;  %1084 = vmatprep.subr.bf16.mxu1 %v1103_v3  ;;  %v1337_v46 = vld [vmem:[%s1886_s5] ss:$0 sm:$0xff] }
   0xe   :  { %359 = vperm.xlu0 %1099, %v334_v11   ;;  %362 = vperm.xlu1 %1100, %v335_v12  }
  0x12   :  { %365 = vperm.xlu0 %1099, %v336_v14   ;;  %368 = vperm.xlu1 %1100, %v337_v15  }
  0x13   :  { %1055 = vmatpush3.bf16.xpose.msra.mxu0 %v1103_v3  ;;  %1092 = vmatpush3.bf16.xpose.msra.mxu1 %v1103_v3 }
  0x14   :  { %1056 = vmatprep.subr.bf16.mxu0 %v1104_v6  ;;  %1085 = vmatprep.subr.bf16.mxu1 %v1104_v6 }
  0x16   :  { %371 = vperm.xlu0 %1099, %v338_v16   ;;  %374 = vperm.xlu1 %1100, %v339_v17  }
  0x1a   :  { %377 = vperm.xlu0 %1099, %v340_v19   ;;  %380 = vperm.xlu1 %1100, %v341_v20  }
  0x1b   :  { %1057 = vmatpush3.bf16.xpose.msra.mxu0 %v1104_v6  ;;  %1093 = vmatpush3.bf16.xpose.msra.mxu1 %v1104_v6 }
  0x1c   :  { %1058 = vmatprep.subr.bf16.mxu0 %v1105_v13  ;;  %1086 = vmatprep.subr.bf16.mxu1 %v1105_v13 }
  0x1e   :  { %383 = vperm.xlu0 %1099, %v342_v21   ;;  %386 = vperm.xlu1 %1100, %v343_v22  }
  0x22   :  { %389 = vperm.xlu0 %1099, %v344_v24   ;;  %392 = vperm.xlu1 %1100, %v345_v25  }
  0x23   :  { %1059 = vmatpush3.bf16.xpose.msra.mxu0 %v1105_v13  ;;  %1094 = vmatpush3.bf16.xpose.msra.mxu1 %v1105_v13 }
  0x24   :  { %1060 = vmatprep.subr.bf16.mxu0 %v1106_v18  ;;  %1087 = vmatprep.subr.bf16.mxu1 %v1106_v18 }
  0x2b   :  { %1061 = vmatpush3.bf16.xpose.msra.mxu0 %v1106_v18  ;;  %1095 = vmatpush3.bf16.xpose.msra.mxu1 %v1106_v18 }
  0x2c   :  { %1062 = vmatprep.subr.bf16.mxu0 %v1107_v23  ;;  %1088 = vmatprep.subr.bf16.mxu1 %v1107_v23 }
  0x33   :  { %1063 = vmatpush3.bf16.xpose.msra.mxu0 %v1107_v23  ;;  %1096 = vmatpush3.bf16.xpose.msra.mxu1 %v1107_v23 }
  0x34   :  { %1064 = vmatprep.subr.bf16.mxu0 %v1108_v26  ;;  %1089 = vmatprep.subr.bf16.mxu1 %v1108_v26 }
  0x3b   :  { %1065 = vmatpush3.bf16.xpose.msra.mxu0 %v1108_v26  ;;  %1097 = vmatpush3.bf16.xpose.msra.mxu1 %v1108_v26 }
  0x42   :  { %1067 = vmatmul.mubr.bf16.vlgmr.msra.gmra.mrb[0].mxu0 %v1111_v27  ;;  %1075 = vmatmul.mubr.bf16.vlgmr.msra.gmra.mrb[0].mxu1 %v1112_v28 }
  0x43   :  { %1070 = vmatprep.mubr.bf16.mxu0 %v1113_v29  ;;  %1078 = vmatprep.mubr.bf16.mxu1 %v1114_v30 }
  0x4a   :  { %1071 = vmatmul.mubr.bf16.gmra.mrb[4].mxu0 %v1115_v31  ;;  %1079 = vmatmul.mubr.bf16.gmra.mrb[4].mxu1 %v1116_v32 }
  0x85   :  { %v1313_v33 = vpop.permute.xlu0 %347  ;;  %v354_v35 = vpop.permute.xlu1 %353 }
  0x86   :  { %vm400_vm0 = vcmp.eq.s32.totalorder %v354_v35, %v1337_v46  ;;  %vm398_vm2 = vcmp.eq.s32.totalorder %v1313_v33, %v1337_v46 }
  0x89   :  { %v1315_v34 = vpop.permute.xlu0 %350  ;;  %v1319_v37 = vpop.permute.xlu1 %356 }
  0x8a   :  { %vm401_vm3 = vcmp.eq.s32.totalorder %v1319_v37, %v1337_v46  ;;  %vm399_vm6 = vcmp.eq.s32.totalorder %v1315_v34, %v1337_v46 }
  0x8d   :  { %v1317_v36 = vpop.permute.xlu0 %359  ;;  %v1323_v39 = vpop.permute.xlu1 %362 }
  0x8e   :  { %vm402_vm11 = vcmp.eq.s32.totalorder %v1317_v36, %v1337_v46  ;;  %vm403_vm14 = vcmp.eq.s32.totalorder %v1323_v39, %v1337_v46 }
  0x91   :  { %v1321_v38 = vpop.permute.xlu0 %365  ;;  %v1327_v41 = vpop.permute.xlu1 %368 }
  0x92   :  { %vm404_vm8 = vcmp.eq.s32.totalorder %v1321_v38, %v1337_v46  ;;  %vm405_vm10 = vcmp.eq.s32.totalorder %v1327_v41, %v1337_v46 }
  0x95   :  { %v1325_v40 = vpop.permute.xlu0 %371  ;;  %v1348_v62 = vpop.permute.xlu1 %374 }
  0x96   :  { %vm406_vm4 = vcmp.eq.s32.totalorder %v1325_v40, %v1337_v46  ;;  %vm407_vm7 = vcmp.eq.s32.totalorder %v1348_v62, %v1337_v46 }
  0x99   :  { %v378_v42 = vpop.permute.xlu0 %377  ;;  %v381_v16 = vpop.permute.xlu1 %380 }
  0x9a   :  { %vm408_vm1 = vcmp.eq.s32.totalorder %v378_v42, %v1337_v46  ;;  %vm409_vm5 = vcmp.eq.s32.totalorder %v381_v16, %v1337_v46 }
  0x9d   :  { %v384_v28 = vpop.permute.xlu0 %383  ;;  %v387_v42 = vpop.permute.xlu1 %386 }
  0x9e   :  { %vm410_vm13 = vcmp.eq.s32.totalorder %v384_v28, %v1337_v46  ;;  %vm411_vm15 = vcmp.eq.s32.totalorder %v387_v42, %v1337_v46 }
  0xa1   :  { %v390_v33 = vpop.permute.xlu0 %389 }
  0xa2   :  { %vm412_vm9 = vcmp.eq.s32.totalorder %v390_v33, %v1337_v46 }
 0x115   :  { %v1068_v43 = vpop.f32.mrb[0].mxu0  ;;  %v1076_v44 = vpop.f32.mrb[0].mxu1 }
 0x116   :  { %v294_v47 = vmul.f32 2.0, %v1068_v43  ;;  %v302_v48 = vmul.f32 2.0, %v1076_v44  ;;  %v222_v49 = vpop.f32.mrb[1].mxu0  ;;  %v254_v50 = vpop.f32.mrb[1].mxu1 }
 0x117   :  { %v292_v51 = vmul.f32 2.0, %v222_v49  ;;  %v1069_v52 = vpop.f32.mrb[2].mxu0  ;;  %v1077_v53 = vpop.f32.mrb[2].mxu1  ;;  %v300_v63 = vmul.f32 2.0, %v254_v50 }
 0x118   :  { %v225_v54 = vpop.f32.mrb[3].mxu0  ;;  %v257_v55 = vpop.f32.mrb[3].mxu1  ;;  %v324_v56 = vsub.f32 %v1332_v45, %v302_v48  ;;  %v316_v57 = vsub.f32 %v1332_v45, %v294_v47  ;;  %v295_v58 = vmul.f32 2.0, %v1069_v52  ;;  %v303_v2 = vmul.f32 2.0, %v1077_v53 }
 0x119   :  { %v314_v61 = vsub.f32 %v1332_v45, %v292_v51  ;;  %v322_v14 = vsub.f32 %v1332_v45, %v300_v63  ;;  %v293_v19 = vmul.f32 2.0, %v225_v54  ;;  %v301_v20 = vmul.f32 2.0, %v257_v55  ;;  %v393_v51 = vpop.permute.xlu1 %392 }
 0x11a   :  { %v440_v59 = vsel %vm408_vm1, %v324_v56, -inf  ;;  %v432_v60 = vsel %vm400_vm0, %v316_v57, -inf  ;;  %v496_v5 = vsel %vm400_vm0, inf, %v316_v57  ;;  %v317_v7 = vsub.f32 %v1332_v45, %v295_v58 }
 0x11b   :  { %597 = vmax.xlane.f32.xlu1 %v440_v59  ;;  %581 = vmax.xlane.f32.xlu0 %v432_v60  ;;  %v430_v6 = vsel %vm398_vm2, %v314_v61, -inf  ;;  %v504_v12 = vsel %vm408_vm1, inf, %v324_v56  ;;  %v325_v15 = vsub.f32 %v1332_v45, %v303_v2  ;;  %v438_v17 = vsel %vm406_vm4, %v322_v14, -inf }
 0x11c   :  { %v433_v13 = vsel %vm401_vm3, %v317_v7, -inf  ;;  %v494_v21 = vsel %vm398_vm2, inf, %v314_v61  ;;  %v497_v22 = vsel %vm401_vm3, inf, %v317_v7  ;;  %v502_v23 = vsel %vm406_vm4, inf, %v322_v14  ;;  %v548_v14 = vld [vmem:[%s1887_s2 + $0x18] sm:$0xff] }
 0x11d   :  { %v1072_v0 = vpop.f32.mrb[4].mxu0  ;;  %v1080_v1 = vpop.f32.mrb[4].mxu1  ;;  %v441_v18 = vsel %vm409_vm5, %v325_v15, -inf  ;;  %v505_v25 = vsel %vm409_vm5, inf, %v325_v15  ;;  %v323_v26 = vsub.f32 %v1332_v45, %v301_v20  ;;  %v315_v27 = vsub.f32 %v1332_v45, %v293_v19 }
 0x11e   :  { %v238_v3 = vpop.f32.mrb[5].mxu0  ;;  %v1352_v4 = vpop.f32.mrb[5].mxu1  ;;  %v298_v24 = vmul.f32 2.0, %v1072_v0  ;;  %v306_v29 = vmul.f32 2.0, %v1080_v1  ;;  %vm413_vm12 = vcmp.eq.s32.totalorder %v393_v51, %v1337_v46  ;;  %v545_v46 = vld [vmem:[%s1887_s2] sm:$0xff] }
 0x11f   :  { %v1081_v8 = vpop.f32.mrb[6].mxu1  ;;  %645 = vmin.xlane.f32.xlu1 %v496_v5  ;;  %577 = vmax.xlane.f32.xlu0 %v430_v6  ;;  %v1073_v9 = vpop.f32.mrb[6].mxu0  ;;  %v439_v30 = vsel %vm407_vm7, %v323_v26, -inf  ;;  %v431_v31 = vsel %vm399_vm6, %v315_v27, -inf  ;;  %v495_v37 = vsel %vm399_vm6, inf, %v315_v27  ;;  %v296_v43 = vmul.f32 2.0, %v238_v3 }
 0x120   :  { %v1360_v10 = vpop.f32.mrb[7].mxu0  ;;  %v1362_v11 = vpop.f32.mrb[7].mxu1  ;;  %v320_v32 = vsub.f32 %v1332_v45, %v298_v24  ;;  %v299_v35 = vmul.f32 2.0, %v1073_v9  ;;  %v328_v40 = vsub.f32 %v1332_v45, %v306_v29  ;;  %v307_v44 = vmul.f32 2.0, %v1081_v8  ;;  %v547_v5 = vld [vmem:[%s1887_s2 + $0x10] sm:$0xff]  ;;  %v556_v24 = vld [vmem:[%s1887_s2 + $0x58] sm:$0xff] }
 0x121   :  { %v503_v47 = vsel %vm407_vm7, inf, %v323_v26  ;;  %v304_v50 = vmul.f32 2.0, %v1352_v4  ;;  %v318_v54 = vsub.f32 %v1332_v45, %v296_v43  ;;  %v297_v56 = vmul.f32 2.0, %v1360_v10 }
 0x122   :  { %v436_v34 = vsel %vm404_vm8, %v320_v32, -inf  ;;  %v444_v48 = vsel %vm412_vm9, %v328_v40, -inf  ;;  %v321_v49 = vsub.f32 %v1332_v45, %v299_v35  ;;  %v500_v52 = vsel %vm404_vm8, inf, %v320_v32 }
 0x123   :  { %661 = vmin.xlane.f32.xlu1 %v504_v12  ;;  %583 = vmax.xlane.f32.xlu0 %v433_v13  ;;  %v329_v55 = vsub.f32 %v1332_v45, %v307_v44  ;;  %v434_v38 = vsel %vm402_vm11, %v318_v54, -inf  ;;  %v326_v58 = vsub.f32 %v1332_v45, %v304_v50  ;;  %v319_v59 = vsub.f32 %v1332_v45, %v297_v56 }
 0x124   :  { %v437_v53 = vsel %vm405_vm10, %v321_v49, -inf  ;;  %v305_v60 = vmul.f32 2.0, %v1362_v11  ;;  %v501_v62 = vsel %vm405_vm10, inf, %v321_v49  ;;  %v498_v0 = vsel %vm402_vm11, inf, %v318_v54 }
 0x125   :  { %v445_v57 = vsel %vm413_vm12, %v329_v55, -inf  ;;  %v442_v61 = vsel %vm410_vm13, %v326_v58, -inf  ;;  %v435_v1 = vsel %vm403_vm14, %v319_v59, -inf  ;;  %v506_v2 = vsel %vm410_vm13, inf, %v326_v58 }
 0x126   :  { %v327_v63 = vsub.f32 %v1332_v45, %v305_v60  ;;  %v508_v41 = vsel %vm412_vm9, inf, %v328_v40  ;;  %v499_v4 = vsel %vm403_vm14, inf, %v319_v59  ;;  %v509_v36 = vsel %vm413_vm12, inf, %v329_v55  ;;  %v555_v45 = vld [vmem:[%s1887_s2 + $0x50] sm:$0xff] }
 0x127   :  { %593 = vmax.xlane.f32.xlu1 %v438_v17  ;;  %599 = vmax.xlane.f32.xlu0 %v441_v18  ;;  %vm993_vm6 = vcmask 7168  }
 0x128   :  { %v443_v3 = vsel %vm411_vm15, %v327_v63, -inf  ;;  %v507_v39 = vsel %vm411_vm15, inf, %v327_v63 }
 0x12b   :  { %641 = vmin.xlane.f32.xlu1 %v494_v21  ;;  %647 = vmin.xlane.f32.xlu0 %v497_v22 }
 0x12f   :  { %657 = vmin.xlane.f32.xlu1 %v502_v23  ;;  %663 = vmin.xlane.f32.xlu0 %v505_v25  ;;  %v553_v23 = vld [vmem:[%s1887_s2 + $0x40] sm:$0xff] }
 0x133   :  { %595 = vmax.xlane.f32.xlu0 %v439_v30  ;;  %579 = vmax.xlane.f32.xlu1 %v431_v31 }
 0x137   :  { %643 = vmin.xlane.f32.xlu0 %v495_v37  ;;  %589 = vmax.xlane.f32.xlu1 %v436_v34 }
 0x13b   :  { %659 = vmin.xlane.f32.xlu0 %v503_v47  ;;  %605 = vmax.xlane.f32.xlu1 %v444_v48 }
 0x13f   :  { %653 = vmin.xlane.f32.xlu1 %v500_v52  ;;  %591 = vmax.xlane.f32.xlu0 %v437_v53 }
 0x143   :  { %585 = vmax.xlane.f32.xlu1 %v434_v38  ;;  %607 = vmax.xlane.f32.xlu0 %v445_v57 }
 0x147   :  { %601 = vmax.xlane.f32.xlu1 %v442_v61  ;;  %655 = vmin.xlane.f32.xlu0 %v501_v62 }
 0x14b   :  { %649 = vmin.xlane.f32.xlu1 %v498_v0  ;;  %587 = vmax.xlane.f32.xlu0 %v435_v1 }
 0x14f   :  { %665 = vmin.xlane.f32.xlu1 %v506_v2  ;;  %603 = vmax.xlane.f32.xlu0 %v443_v3  ;;  %v1510_v3 = vld [vmem:[%s1887_s2 + $0x48] sm:$0xff] }
 0x153   :  { %669 = vmin.xlane.f32.xlu1 %v508_v41  ;;  %651 = vmin.xlane.f32.xlu0 %v499_v4 }
 0x157   :  { %667 = vmin.xlane.f32.xlu0 %v507_v39 }
 0x15b   :  { %671 = vmin.xlane.f32.xlu0 %v509_v36 }
 0x1a8   :  { %v598_v6 = vpop.xlane.xlu1 %597  ;;  %v582_v7 = vpop.xlane.xlu0 %581 }
 0x1a9   :  { %v619_v8 = vadd.f32 %v598_v6, %v555_v45  ;;  %v611_v9 = vadd.f32 %v582_v7, %v547_v5 }
 0x1ab   :  { %v1449_v10 = vmax.f32 %v611_v9, 1e-12  ;;  %v1451_v11 = vmax.f32 %v619_v8, 1e-12 }
 0x1ac   :  { %v646_v12 = vpop.xlane.xlu1 %645  ;;  %v578_v13 = vpop.xlane.xlu0 %577 }
 0x1ad   :  { %1117 = vrsqrt.f32 %v1449_v10  ;;  %v675_v15 = vadd.f32 %v646_v12, %v547_v5  ;;  %v609_v16 = vadd.f32 %v578_v13, %v545_v46  ;;  %vm777_vm0 = vcmp.eq.f32.partialorder %v1451_v11, inf  ;;  %v546_v5 = vld [vmem:[%s1887_s2 + $0x8] sm:$0xff] }
 0x1ae   :  { %1119 = vrsqrt.f32 %v1451_v11  ;;  %v780_v44 = vand.u32 2147483648, %v1451_v11  ;;  %vm721_vm1 = vcmp.eq.f32.partialorder %v1449_v10, inf  ;;  %vm723_vm2 = vcmp.eq.f32.partialorder %v1449_v10, 0.0 }
 0x1af   :  { %v819_v19 = vmax.f32 %v675_v15, 1e-12  ;;  %v1461_v22 = vmax.f32 %v609_v16, 1e-12  ;;  %vm779_vm3 = vcmp.eq.f32.partialorder %v1451_v11, 0.0  ;;  %v724_v47 = vand.u32 2147483648, %v1449_v10 }
 0x1b0   :  { %v662_v17 = vpop.xlane.xlu1 %661  ;;  %v584_v18 = vpop.xlane.xlu0 %583 }
 0x1b1   :  { %v683_v20 = vadd.f32 %v662_v17, %v555_v45  ;;  %v612_v21 = vadd.f32 %v584_v18, %v548_v14  ;;  %1121 = vrsqrt.f32 %v819_v19  ;;  %vm849_vm4 = vcmp.eq.f32.partialorder %v819_v19, inf }
 0x1b2   :  { %1123 = vrsqrt.f32 %v1461_v22  ;;  %vm851_vm5 = vcmp.eq.f32.partialorder %v819_v19, 0.0  ;;  %v852_v53 = vand.u32 2147483648, %v819_v19  ;;  %vm707_vm7 = vcmp.eq.f32.partialorder %v1461_v22, inf }
 0x1b3   :  { %v1469_v27 = vmax.f32 %v683_v20, 1e-12  ;;  %v1471_v28 = vmax.f32 %v612_v21, 1e-12  ;;  %v710_v57 = vand.u32 2147483648, %v1461_v22  ;;  %vm709_vm11 = vcmp.eq.f32.partialorder %v1461_v22, 0.0 }
 0x1b4   :  { %v594_v25 = vpop.xlane.xlu1 %593  ;;  %v600_v26 = vpop.xlane.xlu0 %599 }
 0x1b5   :  { %v617_v29 = vadd.f32 %v594_v25, %v553_v23  ;;  %v620_v30 = vadd.f32 %v600_v26, %v556_v24  ;;  %1125 = vrsqrt.f32 %v1469_v27  ;;  %vm905_vm8 = vcmp.eq.f32.partialorder %v1469_v27, inf }
 0x1b6   :  { %1127 = vrsqrt.f32 %v1471_v28  ;;  %vm907_vm9 = vcmp.eq.f32.partialorder %v1469_v27, 0.0  ;;  %v908_v2 = vand.u32 2147483648, %v1469_v27  ;;  %vm728_vm10 = vcmp.eq.f32.partialorder %v1471_v28, inf }
 0x1b7   :  { %v1118_v31 = vpop.eup %1117  ;;  %v1477_v37 = vmax.f32 %v617_v29, 1e-12  ;;  %v1479_v40 = vmax.f32 %v620_v30, 1e-12  ;;  %vm730_vm12 = vcmp.eq.f32.partialorder %v1471_v28, 0.0  ;;  %v731_v7 = vand.u32 2147483648, %v1471_v28 }
 0x1b8   :  { %v642_v32 = vpop.xlane.xlu1 %641  ;;  %v648_v33 = vpop.xlane.xlu0 %647  ;;  %v720_v35 = vmul.f32 %v1118_v31, %v1449_v10 }
 0x1b9   :  { %v1120_v34 = vpop.eup %1119  ;;  %v673_v42 = vadd.f32 %v642_v32, %v545_v46  ;;  %v676_v43 = vadd.f32 %v648_v33, %v548_v14  ;;  %1129 = vrsqrt.f32 %v1477_v37  ;;  %vm763_vm13 = vcmp.eq.f32.partialorder %v1477_v37, inf }
 0x1ba   :  { %v776_v51 = vmul.f32 %v1120_v34, %v1451_v11  ;;  %v722_v52 = vsel %vm721_vm1, %v1449_v10, %v720_v35  ;;  %1131 = vrsqrt.f32 %v1479_v40  ;;  %v766_v21 = vand.u32 2147483648, %v1477_v37 }
 0x1bb   :  { %v1122_v50 = vpop.eup %1121  ;;  %v1490_v54 = vmax.f32 %v673_v42, 1e-12  ;;  %v1493_v56 = vmax.f32 %v676_v43, 1e-12  ;;  %v725_v0 = vsel %vm723_vm2, %v724_v47, %v722_v52  ;;  %vm765_vm14 = vcmp.eq.f32.partialorder %v1477_v37, 0.0 }
 0x1bc   :  { %v658_v48 = vpop.xlane.xlu1 %657  ;;  %v664_v49 = vpop.xlane.xlu0 %663  ;;  %v848_v55 = vmul.f32 %v1122_v50, %v819_v19  ;;  %v778_v4 = vsel %vm777_vm0, %v1451_v11, %v776_v51  ;;  %vm784_vm1 = vcmp.eq.f32.partialorder %v1479_v40, inf  ;;  %v551_v50 = vld [vmem:[%s1887_s2 + $0x30] sm:$0xff] }
 0x1bd   :  { %v681_v38 = vadd.f32 %v658_v48, %v553_v23  ;;  %1133 = vrsqrt.f32 %v1490_v54  ;;  %v684_v58 = vadd.f32 %v664_v49, %v556_v24  ;;  %v1124_v59 = vpop.eup %1123  ;;  %v781_v14 = vsel %vm779_vm3, %v780_v44, %v778_v4 }
 0x1be   :  { %v850_v60 = vsel %vm849_vm4, %v819_v19, %v848_v55  ;;  %1135 = vrsqrt.f32 %v1493_v56  ;;  %v706_v6 = vmul.f32 %v1124_v59, %v1461_v22  ;;  %v787_v23 = vand.u32 2147483648, %v1479_v40 }
 0x1bf   :  { %v1126_v63 = vpop.eup %1125  ;;  %v853_v1 = vsel %vm851_vm5, %v852_v53, %v850_v60  ;;  %v1517_v45 = vmax.f32 %v681_v38, 1e-12  ;;  %v1525_v8 = vmax.f32 %v684_v58, 1e-12  ;;  %vm835_vm15 = vcmp.eq.f32.partialorder %v1490_v54, inf }
 0x1c0   :  { %v596_v61 = vpop.xlane.xlu0 %595  ;;  %v580_v62 = vpop.xlane.xlu1 %579  ;;  %v947_v39 = vsub.f32 %v725_v0, %v853_v1  ;;  %v904_v36 = vmul.f32 %v1126_v63, %v1469_v27  ;;  %vm837_vm0 = vcmp.eq.f32.partialorder %v1490_v54, 0.0  ;;  %v708_v24 = vsel %vm707_vm7, %v1461_v22, %v706_v6 }
 0x1c1   :  { %v1128_v41 = vpop.eup %1127  ;;  %1137 = vrsqrt.f32 %v1517_v45  ;;  %v618_v12 = vadd.f32 %v596_v61, %v1510_v3  ;;  %v610_v17 = vadd.f32 %v580_v62, %v546_v5  ;;  %v838_v26 = vand.u32 2147483648, %v1490_v54 }
 0x1c2   :  { %v963_v9 = vadd.f32 0.6, %v947_v39  ;;  %v906_v10 = vsel %vm905_vm8, %v1469_v27, %v904_v36  ;;  %v727_v16 = vmul.f32 %v1128_v41, %v1471_v28  ;;  %1139 = vrsqrt.f32 %v1525_v8 }
 0x1c3   :  { %v909_v15 = vsel %vm907_vm9, %v908_v2, %v906_v10  ;;  %v1130_v18 = vpop.eup %1129  ;;  %v1552_v27 = vmax.f32 %v618_v12, 1e-12  ;;  %v1561_v35 = vmax.f32 %v610_v17, 1e-12  ;;  %vm856_vm2 = vcmp.eq.f32.partialorder %v1493_v56, inf }
 0x1c4   :  { %v644_v46 = vpop.xlane.xlu0 %643  ;;  %v590_v13 = vpop.xlane.xlu1 %589  ;;  %v979_v19 = vmax.f32 %v963_v9, 0.0  ;;  %v955_v20 = vsub.f32 %v781_v14, %v909_v15  ;;  %v729_v32 = vsel %vm728_vm10, %v1471_v28, %v727_v16  ;;  %v762_v33 = vmul.f32 %v1130_v18, %v1477_v37 }
 0x1c5   :  { %v1132_v11 = vpop.eup %1131  ;;  %v674_v34 = vadd.f32 %v644_v46, %v546_v5  ;;  %vm858_vm3 = vcmp.eq.f32.partialorder %v1493_v56, 0.0  ;;  %v711_v47 = vsel %vm709_vm11, %v710_v57, %v708_v24  ;;  %v859_v49 = vand.u32 2147483648, %v1493_v56 }
 0x1c6   :  { %996 = vst.msk [vmem:[%s1888_s6 + $0x10] sm:$0xff] %vm993_vm6, %v979_v19  ;;  %v971_v25 = vadd.f32 0.6, %v955_v20  ;;  %1141 = vrsqrt.f32 %v1552_v27  ;;  %v732_v51 = vsel %vm730_vm12, %v731_v7, %v729_v32  ;;  %v783_v22 = vmul.f32 %v1132_v11, %v1479_v40 }
 0x1c7   :  { %v1134_v31 = vpop.eup %1133  ;;  %1143 = vrsqrt.f32 %v1561_v35  ;;  %v764_v38 = vsel %vm763_vm13, %v1477_v37, %v762_v33  ;;  %v1595_v58 = vmax.f32 %v674_v34, 1e-12  ;;  %v615_v62 = vadd.f32 %v590_v13, %v551_v50 }
 0x1c8   :  { %v660_v29 = vpop.xlane.xlu0 %659  ;;  %v1554_v30 = vpop.xlane.xlu1 %605  ;;  %v987_v43 = vmax.f32 %v971_v25, 0.0  ;;  %v834_v44 = vmul.f32 %v1134_v31, %v1490_v54  ;;  %vm891_vm4 = vcmp.eq.f32.partialorder %v1517_v45, inf  ;;  %vm893_vm5 = vcmp.eq.f32.partialorder %v1517_v45, 0.0 }
 0x1c9   :  { %v1136_v42 = vpop.eup %1135  ;;  %v682_v63 = vadd.f32 %v660_v29, %v1510_v3  ;;  %1145 = vrsqrt.f32 %v1595_v58  ;;  %v894_v41 = vand.u32 2147483648, %v1517_v45  ;;  %v1610_v5 = vmax.f32 %v615_v62, 1e-12 }
 0x1ca   :  { %v855_v48 = vmul.f32 %v1136_v42, %v1493_v56  ;;  %1004 = vst.msk [vmem:[%s1888_s6 + $0x50] sm:$0xff] %vm993_vm6, %v987_v43  ;;  %v836_v52 = vsel %vm835_vm15, %v1490_v54, %v834_v44  ;;  %v767_v54 = vsel %vm765_vm14, %v766_v21, %v764_v38  ;;  %v785_v37 = vsel %vm784_vm1, %v1479_v40, %v783_v22  ;;  %v549_v43 = vld [vmem:[%s1887_s2 + $0x20] sm:$0xff] }
 0x1cb   :  { %v839_v57 = vsel %vm837_vm0, %v838_v26, %v836_v52  ;;  %v1138_v59 = vpop.eup %1137  ;;  %v1612_v6 = vmax.f32 %v682_v63, 1e-12  ;;  %vm912_vm7 = vcmp.eq.f32.partialorder %v1525_v8, inf  ;;  %v915_v13 = vand.u32 2147483648, %v1525_v8 }
 0x1cc   :  { %v654_v53 = vpop.xlane.xlu1 %653  ;;  %v592_v55 = vpop.xlane.xlu0 %591  ;;  %v857_v28 = vsel %vm856_vm2, %v1493_v56, %v855_v48  ;;  %v945_v60 = vsub.f32 %v711_v47, %v839_v57  ;;  %v890_v1 = vmul.f32 %v1138_v59, %v1517_v45  ;;  %vm786_vm8 = vcmp.eq.f32.partialorder %v1479_v40, 0.0  ;;  %v1661_v48 = vld [vmem:[%s1887_s2 + $0x70] sm:$0xff] }
 0x1cd   :  { %v860_v61 = vsel %vm858_vm3, %v859_v49, %v857_v28  ;;  %v1140_v39 = vpop.eup %1139  ;;  %vm914_vm9 = vcmp.eq.f32.partialorder %v1525_v8, 0.0  ;;  %1147 = vrsqrt.f32 %v1612_v6  ;;  %v788_v16 = vsel %vm786_vm8, %v787_v23, %v785_v37  ;;  %v1694_v37 = vld [vmem:[%s1887_s2 + $0x78] sm:$0xff] }
 0x1ce   :  { %v948_v0 = vsub.f32 %v732_v51, %v860_v61  ;;  %v961_v2 = vadd.f32 0.6, %v945_v60  ;;  %v892_v36 = vsel %vm891_vm4, %v1517_v45, %v890_v1  ;;  %v911_v10 = vmul.f32 %v1140_v39, %v1525_v8 }
 0x1cf   :  { %v895_v9 = vsel %vm893_vm5, %v894_v41, %v892_v36  ;;  %1149 = vrsqrt.f32 %v1610_v5  ;;  %v679_v21 = vadd.f32 %v654_v53, %v551_v50  ;;  %vm714_vm10 = vcmp.eq.f32.partialorder %v1561_v35, inf }
 0x1d0   :  { %v586_v56 = vpop.xlane.xlu1 %585  ;;  %v1607_v4 = vpop.xlane.xlu0 %607  ;;  %v964_v3 = vadd.f32 0.6, %v948_v0  ;;  %v977_v7 = vmax.f32 %v961_v2, 0.0  ;;  %v953_v46 = vsub.f32 %v767_v54, %v895_v9  ;;  %v913_v45 = vsel %vm912_vm7, %v1525_v8, %v911_v10  ;;  %v552_v8 = vld [vmem:[%s1887_s2 + $0x38] sm:$0xff]  ;;  %v550_v9 = vld [vmem:[%s1887_s2 + $0x28] sm:$0xff] }
 0x1d1   :  { %v1142_v15 = vpop.eup %1141  ;;  %v916_v18 = vsel %vm914_vm9, %v915_v13, %v913_v45  ;;  %v616_v25 = vadd.f32 %v592_v55, %v552_v8  ;;  %v1645_v31 = vmax.f32 %v679_v21, 1e-12  ;;  %vm770_vm11 = vcmp.eq.f32.partialorder %v1552_v27, inf }
 0x1d2   :  { %v980_v12 = vmax.f32 %v964_v3, 0.0  ;;  %994 = vst.msk [vmem:[%s1888_s6] sm:$0xff] %vm993_vm6, %v977_v7  ;;  %v969_v17 = vadd.f32 0.6, %v953_v46  ;;  %v1144_v19 = vpop.eup %1143  ;;  %v956_v20 = vsub.f32 %v788_v16, %v916_v18  ;;  %v769_v29 = vmul.f32 %v1142_v15, %v1552_v27 }
 0x1d3   :  { %v713_v40 = vmul.f32 %v1144_v19, %v1561_v35  ;;  %v1146_v26 = vpop.eup %1145  ;;  %v717_v44 = vand.u32 2147483648, %v1561_v35  ;;  %vm842_vm12 = vcmp.eq.f32.partialorder %v1595_v58, inf  ;;  %v845_v47 = vand.u32 2147483648, %v1595_v58 }
 0x1d4   :  { %v656_v14 = vpop.xlane.xlu0 %655  ;;  %997 = vst.msk [vmem:[%s1888_s6 + $0x18] sm:$0xff] %vm993_vm6, %v980_v12  ;;  %v602_v11 = vpop.xlane.xlu1 %601  ;;  %v985_v24 = vmax.f32 %v969_v17, 0.0  ;;  %v972_v23 = vadd.f32 0.6, %v956_v20  ;;  %v841_v42 = vmul.f32 %v1146_v26, %v1595_v58  ;;  %1151 = vrsqrt.f32 %v1645_v31 }
 0x1d5   :  { %v715_v34 = vsel %vm714_vm10, %v1561_v35, %v713_v40  ;;  %vm716_vm13 = vcmp.eq.f32.partialorder %v1561_v35, 0.0  ;;  %vm844_vm14 = vcmp.eq.f32.partialorder %v1595_v58, 0.0  ;;  %v1671_v50 = vmax.f32 %v616_v25, 1e-12 }
 0x1d6   :  { %1002 = vst.msk [vmem:[%s1888_s6 + $0x40] sm:$0xff] %vm993_vm6, %v985_v24  ;;  %v988_v33 = vmax.f32 %v972_v23, 0.0  ;;  %v843_v49 = vsel %vm842_vm12, %v1595_v58, %v841_v42  ;;  %v771_v22 = vsel %vm770_vm11, %v1552_v27, %v769_v29  ;;  %v718_v52 = vsel %vm716_vm13, %v717_v44, %v715_v34  ;;  %v557_v58 = vld [vmem:[%s1887_s2 + $0x60] sm:$0xff] }
 0x1d7   :  { %v846_v53 = vsel %vm844_vm14, %v845_v47, %v843_v49  ;;  %v613_v55 = vadd.f32 %v586_v56, %v549_v43  ;;  %v1148_v38 = vpop.eup %1147  ;;  %vm772_vm15 = vcmp.eq.f32.partialorder %v1552_v27, 0.0  ;;  %v773_v57 = vand.u32 2147483648, %v1552_v27 }
 0x1d8   :  { %v1647_v32 = vpop.xlane.xlu0 %587  ;;  %1005 = vst.msk [vmem:[%s1888_s6 + $0x58] sm:$0xff] %vm993_vm6, %v988_v33  ;;  %v650_v51 = vpop.xlane.xlu1 %649  ;;  %v946_v28 = vsub.f32 %v718_v52, %v846_v53  ;;  %v623_v35 = vadd.f32 %v1554_v30, %v1661_v48  ;;  %v897_v60 = vmul.f32 %v1148_v38, %v1612_v6  ;;  %vm898_vm0 = vcmp.eq.f32.partialorder %v1612_v6, inf }
 0x1d9   :  { %v1150_v59 = vpop.eup %1149  ;;  %vm900_vm1 = vcmp.eq.f32.partialorder %v1612_v6, 0.0  ;;  %v1684_v61 = vmax.f32 %v613_v55, 1e-12  ;;  %v774_v63 = vsel %vm772_vm15, %v773_v57, %v771_v22  ;;  %v901_v0 = vand.u32 2147483648, %v1612_v6 }
 0x1da   :  { %v962_v27 = vadd.f32 0.6, %v946_v28  ;;  %1153 = vrsqrt.f32 %v1671_v50  ;;  %v899_v30 = vsel %vm898_vm0, %v1612_v6, %v897_v60  ;;  %v621_v1 = vadd.f32 %v602_v11, %v557_v58 }
 0x1db   :  { %1155 = vrsqrt.f32 %v1684_v61  ;;  %v680_v54 = vadd.f32 %v656_v14, %v552_v8  ;;  %v748_v41 = vmul.f32 %v1150_v59, %v1610_v5  ;;  %v902_v56 = vsel %vm900_vm1, %v901_v0, %v899_v30 }
 0x1dc   :  { %v604_v62 = vpop.xlane.xlu0 %603  ;;  %v978_v2 = vmax.f32 %v962_v27, 0.0  ;;  %v677_v39 = vadd.f32 %v650_v51, %v549_v43  ;;  %v666_v3 = vpop.xlane.xlu1 %665  ;;  %v954_v36 = vsub.f32 %v774_v63, %v902_v56  ;;  %vm749_vm2 = vcmp.eq.f32.partialorder %v1610_v5, inf }
 0x1dd   :  { %vm751_vm3 = vcmp.eq.f32.partialorder %v1610_v5, 0.0  ;;  %v752_v6 = vand.u32 2147483648, %v1610_v5  ;;  %v1703_v7 = vmax.f32 %v623_v35, 1e-12  ;;  %v1708_v46 = vmax.f32 %v621_v1, 1e-12 }
 0x1de   :  { %995 = vst.msk [vmem:[%s1888_s6 + $0x8] sm:$0xff] %vm993_vm6, %v978_v2  ;;  %v1152_v10 = vpop.eup %1151  ;;  %v970_v12 = vadd.f32 0.6, %v954_v36  ;;  %v1710_v13 = vmax.f32 %v680_v54, 1e-12  ;;  %v750_v14 = vsel %vm749_vm2, %v1610_v5, %v748_v41  ;;  %v624_v16 = vadd.f32 %v1607_v4, %v1694_v37  ;;  %v558_v4 = vld [vmem:[%s1887_s2 + $0x68] sm:$0xff] }
 0x1df   :  { %v876_v15 = vmul.f32 %v1152_v10, %v1645_v31  ;;  %v1716_v17 = vmax.f32 %v677_v39, 1e-12  ;;  %vm877_vm4 = vcmp.eq.f32.partialorder %v1645_v31, inf  ;;  %v880_v8 = vand.u32 2147483648, %v1645_v31 }
 0x1e0   :  { %v652_v45 = vpop.xlane.xlu0 %651  ;;  %v986_v18 = vmax.f32 %v970_v12, 0.0  ;;  %1157 = vrsqrt.f32 %v1710_v13  ;;  %vm879_vm5 = vcmp.eq.f32.partialorder %v1645_v31, 0.0  ;;  %v614_v20 = vadd.f32 %v1647_v32, %v550_v9  ;;  %v670_v21 = vpop.xlane.xlu1 %669 }
 0x1e1   :  { %v878_v19 = vsel %vm877_vm4, %v1645_v31, %v876_v15  ;;  %1159 = vrsqrt.f32 %v1716_v17  ;;  %v753_v11 = vsel %vm751_vm3, %v752_v6, %v750_v14  ;;  %v1735_v25 = vmax.f32 %v624_v16, 1e-12 }
 0x1e2   :  { %1003 = vst.msk [vmem:[%s1888_s6 + $0x48] sm:$0xff] %vm993_vm6, %v986_v18  ;;  %v881_v24 = vsel %vm879_vm5, %v880_v8, %v878_v19  ;;  %1161 = vrsqrt.f32 %v1708_v46  ;;  %v685_v29 = vadd.f32 %v666_v3, %v557_v58  ;;  %v622_v31 = vadd.f32 %v604_v62, %v558_v4 }
 0x1e3   :  { %v951_v23 = vsub.f32 %v753_v11, %v881_v24  ;;  %1163 = vrsqrt.f32 %v1703_v7  ;;  %v687_v5 = vadd.f32 %v670_v21, %v1661_v48  ;;  %v1739_v34 = vmax.f32 %v614_v20, 1e-12 }
 0x1e4   :  { %v1154_v40 = vpop.eup %1153  ;;  %v668_v32 = vpop.xlane.xlu0 %667  ;;  %vm756_vm7 = vcmp.eq.f32.partialorder %v1671_v50, inf  ;;  %vm758_vm8 = vcmp.eq.f32.partialorder %v1671_v50, 0.0  ;;  %v1744_v43 = vmax.f32 %v685_v29, 1e-12  ;;  %1165 = vrsqrt.f32 %v1735_v25 }
 0x1e5   :  { %v1156_v26 = vpop.eup %1155  ;;  %v967_v33 = vadd.f32 0.6, %v951_v23  ;;  %v755_v42 = vmul.f32 %v1154_v40, %v1671_v50  ;;  %v1748_v49 = vmax.f32 %v687_v5, 1e-12  ;;  %v759_v48 = vand.u32 2147483648, %v1671_v50 }
 0x1e6   :  { %v734_v47 = vmul.f32 %v1156_v26, %v1684_v61  ;;  %vm735_vm9 = vcmp.eq.f32.partialorder %v1684_v61, inf  ;;  %1167 = vrsqrt.f32 %v1744_v43  ;;  %v1753_v51 = vmax.f32 %v622_v31, 1e-12 }
 0x1e7   :  { %v983_v44 = vmax.f32 %v967_v33, 0.0  ;;  %vm737_vm10 = vcmp.eq.f32.partialorder %v1684_v61, 0.0  ;;  %v738_v22 = vand.u32 2147483648, %v1684_v61  ;;  %1169 = vrsqrt.f32 %v1739_v34 }
 0x1e8   :  { %v678_v52 = vadd.f32 %v652_v45, %v550_v9  ;;  %v757_v55 = vsel %vm756_vm7, %v1671_v50, %v755_v42  ;;  %vm884_vm11 = vcmp.eq.f32.partialorder %v1710_v13, inf  ;;  %vm886_vm12 = vcmp.eq.f32.partialorder %v1710_v13, 0.0  ;;  %v672_v57 = vpop.xlane.xlu0 %671 }
 0x1e9   :  { %1000 = vst.msk [vmem:[%s1888_s6 + $0x30] sm:$0xff] %vm993_vm6, %v983_v44  ;;  %v887_v38 = vand.u32 2147483648, %v1710_v13  ;;  %v736_v35 = vsel %vm735_vm9, %v1684_v61, %v734_v47  ;;  %vm863_vm13 = vcmp.eq.f32.partialorder %v1716_v17, inf  ;;  %1171 = vrsqrt.f32 %v1748_v49 }
 0x1ea   :  { %v1158_v53 = vpop.eup %1157  ;;  %vm865_vm14 = vcmp.eq.f32.partialorder %v1716_v17, 0.0  ;;  %v866_v62 = vand.u32 2147483648, %v1716_v17  ;;  %1173 = vrsqrt.f32 %v1753_v51  ;;  %v1777_v27 = vmax.f32 %v678_v52, 1e-12 }
 0x1eb   :  { %v1160_v28 = vpop.eup %1159  ;;  %v883_v58 = vmul.f32 %v1158_v53, %v1710_v13  ;;  %v686_v0 = vadd.f32 %v668_v32, %v558_v4  ;;  %v688_v30 = vadd.f32 %v672_v57, %v1694_v37  ;;  %v760_v54 = vsel %vm758_vm8, %v759_v48, %v757_v55 }
 0x1ec   :  { %v1162_v59 = vpop.eup %1161  ;;  %v862_v60 = vmul.f32 %v1160_v28, %v1716_v17  ;;  %v739_v2 = vsel %vm737_vm10, %v738_v22, %v736_v35  ;;  %1175 = vrsqrt.f32 %v1777_v27  ;;  %vm805_vm15 = vcmp.eq.f32.partialorder %v1703_v7, inf }
 0x1ed   :  { %v885_v63 = vsel %vm884_vm11, %v1710_v13, %v883_v58  ;;  %v1164_v1 = vpop.eup %1163  ;;  %v790_v39 = vmul.f32 %v1162_v59, %v1708_v46  ;;  %vm807_vm0 = vcmp.eq.f32.partialorder %v1703_v7, 0.0  ;;  %v1792_v9 = vmax.f32 %v686_v0, 1e-12 }
 0x1ee   :  { %v888_v41 = vsel %vm886_vm12, %v887_v38, %v885_v63  ;;  %v864_v56 = vsel %vm863_vm13, %v1716_v17, %v862_v60  ;;  %v1166_v37 = vpop.eup %1165  ;;  %v804_v61 = vmul.f32 %v1164_v1, %v1703_v7  ;;  %v1794_v10 = vmax.f32 %v688_v30, 1e-12 }
 0x1ef   :  { %v952_v3 = vsub.f32 %v760_v54, %v888_v41  ;;  %v867_v36 = vsel %vm865_vm14, %v866_v62, %v864_v56  ;;  %v808_v13 = vand.u32 2147483648, %v1703_v7  ;;  %vm791_vm1 = vcmp.eq.f32.partialorder %v1708_v46, inf }
 0x1f0   :  { %v949_v50 = vsub.f32 %v739_v2, %v867_v36  ;;  %v1168_v12 = vpop.eup %1167  ;;  %vm793_vm2 = vcmp.eq.f32.partialorder %v1708_v46, 0.0  ;;  %v792_v15 = vsel %vm791_vm1, %v1708_v46, %v790_v39  ;;  %1177 = vrsqrt.f32 %v1792_v9 }
 0x1f1   :  { %v968_v6 = vadd.f32 0.6, %v952_v3  ;;  %v1170_v14 = vpop.eup %1169  ;;  %v918_v17 = vmul.f32 %v1168_v12, %v1744_v43  ;;  %v794_v18 = vand.u32 2147483648, %v1708_v46  ;;  %vm919_vm3 = vcmp.eq.f32.partialorder %v1744_v43, inf }
 0x1f2   :  { %v965_v45 = vadd.f32 0.6, %v949_v50  ;;  %v922_v19 = vand.u32 2147483648, %v1744_v43  ;;  %v806_v4 = vsel %vm805_vm15, %v1703_v7, %v804_v61  ;;  %vm921_vm4 = vcmp.eq.f32.partialorder %v1744_v43, 0.0 }
 0x1f3   :  { %v984_v16 = vmax.f32 %v968_v6, 0.0  ;;  %v1172_v20 = vpop.eup %1171  ;;  %v920_v21 = vsel %vm919_vm3, %v1744_v43, %v918_v17  ;;  %1179 = vrsqrt.f32 %v1794_v10  ;;  %v795_v24 = vsel %vm793_vm2, %v794_v18, %v792_v15 }
 0x1f4   :  { %v981_v8 = vmax.f32 %v965_v45, 0.0  ;;  %v1174_v11 = vpop.eup %1173  ;;  %v741_v40 = vmul.f32 %v1170_v14, %v1739_v34  ;;  %v923_v23 = vsel %vm921_vm4, %v922_v19, %v920_v21  ;;  %v932_v26 = vmul.f32 %v1172_v20, %v1748_v49 }
 0x1f5   :  { %1001 = vst.msk [vmem:[%s1888_s6 + $0x38] sm:$0xff] %vm993_vm6, %v984_v16  ;;  %vm812_vm5 = vcmp.eq.f32.partialorder %v1735_v25, inf  ;;  %v957_v29 = vsub.f32 %v795_v24, %v923_v23  ;;  %vm933_vm7 = vcmp.eq.f32.partialorder %v1748_v49, inf  ;;  %v936_v31 = vand.u32 2147483648, %v1748_v49 }
 0x1f6   :  { %998 = vst.msk [vmem:[%s1888_s6 + $0x20] sm:$0xff] %vm993_vm6, %v981_v8  ;;  %v809_v46 = vsel %vm807_vm0, %v808_v13, %v806_v4  ;;  %v815_v5 = vand.u32 2147483648, %v1735_v25  ;;  %v934_v32 = vsel %vm933_vm7, %v1748_v49, %v932_v26  ;;  %vm935_vm8 = vcmp.eq.f32.partialorder %v1748_v49, 0.0  ;;  %v1176_v33 = vpop.eup %1175 }
 0x1f7   :  { %v811_v42 = vmul.f32 %v1166_v37, %v1735_v25  ;;  %vm742_vm9 = vcmp.eq.f32.partialorder %v1739_v34, inf  ;;  %v973_v43 = vadd.f32 0.6, %v957_v29  ;;  %v937_v44 = vsel %vm935_vm8, %v936_v31, %v934_v32 }
 0x1f8   :  { %vm814_vm10 = vcmp.eq.f32.partialorder %v1735_v25, 0.0  ;;  %v743_v47 = vsel %vm742_vm9, %v1739_v34, %v741_v40  ;;  %v797_v7 = vmul.f32 %v1174_v11, %v1753_v51  ;;  %v959_v48 = vsub.f32 %v809_v46, %v937_v44 }
 0x1f9   :  { %v869_v22 = vmul.f32 %v1176_v33, %v1777_v27  ;;  %v745_v52 = vand.u32 2147483648, %v1739_v34  ;;  %v989_v53 = vmax.f32 %v973_v43, 0.0  ;;  %vm870_vm11 = vcmp.eq.f32.partialorder %v1777_v27, inf }
 0x1fa   :  { %v873_v49 = vand.u32 2147483648, %v1777_v27  ;;  %vm744_vm12 = vcmp.eq.f32.partialorder %v1739_v34, 0.0  ;;  %v975_v55 = vadd.f32 0.6, %v959_v48  ;;  %vm872_vm13 = vcmp.eq.f32.partialorder %v1777_v27, 0.0  ;;  %v1178_v57 = vpop.eup %1177 }
 0x1fb   :  { %v871_v38 = vsel %vm870_vm11, %v1777_v27, %v869_v22  ;;  %v813_v28 = vsel %vm812_vm5, %v1735_v25, %v811_v42  ;;  %v746_v35 = vsel %vm744_vm12, %v745_v52, %v743_v47  ;;  %1006 = vst.msk [vmem:[%s1888_s6 + $0x60] sm:$0xff] %vm993_vm6, %v989_v53  ;;  %vm798_vm14 = vcmp.eq.f32.partialorder %v1753_v51, inf }
 0x1fc   :  { %v874_v58 = vsel %vm872_vm13, %v873_v49, %v871_v38  ;;  %v799_v34 = vsel %vm798_vm14, %v1753_v51, %v797_v7  ;;  %v991_v59 = vmax.f32 %v975_v55, 0.0  ;;  %v925_v62 = vmul.f32 %v1178_v57, %v1792_v9 }
 0x1fd   :  { %v950_v60 = vsub.f32 %v746_v35, %v874_v58  ;;  %v1180_v63 = vpop.eup %1179  ;;  %vm800_vm15 = vcmp.eq.f32.partialorder %v1753_v51, 0.0  ;;  %v801_v27 = vand.u32 2147483648, %v1753_v51  ;;  %vm926_vm0 = vcmp.eq.f32.partialorder %v1792_v9, inf }
 0x1fe   :  { %v929_v0 = vand.u32 2147483648, %v1792_v9  ;;  %1008 = vst.msk [vmem:[%s1888_s6 + $0x70] sm:$0xff] %vm993_vm6, %v991_v59  ;;  %v927_v1 = vsel %vm926_vm0, %v1792_v9, %v925_v62  ;;  %vm928_vm1 = vcmp.eq.f32.partialorder %v1792_v9, 0.0  ;;  %v939_v54 = vmul.f32 %v1180_v63, %v1794_v10 }
 0x1ff   :  { %v966_v30 = vadd.f32 0.6, %v950_v60  ;;  %v802_v2 = vsel %vm800_vm15, %v801_v27, %v799_v34  ;;  %vm940_vm2 = vcmp.eq.f32.partialorder %v1794_v10, inf  ;;  %v943_v51 = vand.u32 2147483648, %v1794_v10 }
 0x200   :  { %v930_v41 = vsel %vm928_vm1, %v929_v0, %v927_v1  ;;  %v941_v3 = vsel %vm940_vm2, %v1794_v10, %v939_v54  ;;  %vm942_vm3 = vcmp.eq.f32.partialorder %v1794_v10, 0.0  ;;  %v816_v36 = vsel %vm814_vm10, %v815_v5, %v813_v28 }
 0x201   :  { %v982_v56 = vmax.f32 %v966_v30, 0.0  ;;  %v958_v39 = vsub.f32 %v802_v2, %v930_v41  ;;  %v944_v50 = vsel %vm942_vm3, %v943_v51, %v941_v3 }
 0x202   :  { %v960_v61 = vsub.f32 %v816_v36, %v944_v50 }
 0x203   :  { %999 = vst.msk [vmem:[%s1888_s6 + $0x28] sm:$0xff] %vm993_vm6, %v982_v56  ;;  %v974_v37 = vadd.f32 0.6, %v958_v39 }
 0x204   :  { %v976_v9 = vadd.f32 0.6, %v960_v61 }
 0x205   :  { %v990_v6 = vmax.f32 %v974_v37, 0.0 }
 0x206   :  { %v992_v12 = vmax.f32 %v976_v9, 0.0 }
 0x207   :  { %1007 = vst.msk [vmem:[%s1888_s6 + $0x68] sm:$0xff] %vm993_vm6, %v990_v6 }
 0x208   :  { %1009 = vst.msk [vmem:[%s1888_s6 + $0x78] sm:$0xff] %vm993_vm6, %v992_v12 }

</bundles_post_ra>
